<compile_context>
chip_gen: v5e
topology: v5e:2x2
jax: 0.10.0
libtpu: 0.0.40
codegen_flags: <defaults>
</compile_context>

<pallas_src>
import functools
import math

import jax
import jax.numpy as jnp
from jax.experimental import pallas as pl
from jax.experimental.pallas import tpu as pltpu

# -log(1e-4): the only surviving constant of the clamped-one-hot log.
_RCE_CONST = -math.log(1e-4)

_LANE = 128
_SUBLANE = 8


def _nce_rce_kernel(pred_ref, labels_ref, out_ref, *, alpha, beta, n_rows, tile_n):
    # pred_ref: (TILE_N, C) in the input dtype; cast per-tile (keeps HBM bf16).
    pred = pred_ref[...].astype(jnp.float32)
    labels = labels_ref[...]                                  # (TILE_N, 1) int32
    tn, c = pred.shape

    # Row statistics WITHOUT materializing `shifted = pred - m`:
    m = jnp.max(pred, axis=1, keepdims=True)                              # (TILE_N, 1)
    rowsum = jnp.sum(pred, axis=1, keepdims=True) - float(c) * m          # sum_j (p_j - m)
    sumexp = jnp.sum(jnp.exp(pred - m), axis=1, keepdims=True)            # subtract fuses into exp
    logsumexp = jnp.log(sumexp)                                           # (TILE_N, 1)

    # pred at the label position, no one-hot matrix; shift by m afterwards.
    class_ids = jax.lax.broadcasted_iota(jnp.int32, (tn, c), 1)
    pred_y = jnp.sum(jnp.where(class_ids == labels, pred, 0.0),
                     axis=1, keepdims=True)                               # (TILE_N, 1)
    shifted_y = pred_y - m

    # ---- Normalized Cross Entropy ----
    num = logsumexp - shifted_y                       # -log p_y
    den = float(c) * logsumexp - rowsum               # -sum_j log p_j
    nce = num * pl.reciprocal(den, approx=True)       # (TILE_N, 1)

    # ---- Reverse Cross Entropy (closed form) ----
    p_y = jnp.exp(shifted_y - logsumexp)              # softmax at the label
    rce = _RCE_CONST * (1.0 - p_y)                    # (TILE_N, 1)

    loss = alpha * nce + beta * rce                   # (TILE_N, 1)

    if n_rows % tile_n:
        # Ragged last tile: zero the padded (garbage) rows before reducing.
        rows_remaining = n_rows - pl.program_id(0) * tile_n
        row_ids = jax.lax.broadcasted_iota(jnp.int32, (tn, 1), 0)
        loss = jnp.where(row_ids < rows_remaining, loss, 0.0)

    # Lane-dense (8, 128) partial-sum block: single unmasked vector store.
    tile_sum = jnp.sum(loss, axis=(0, 1), keepdims=True)      # (1, 1)
    out_ref[...] = jnp.broadcast_to(tile_sum, (_SUBLANE, _LANE)).astype(jnp.float32)


def _is_v7x():
    try:
        return "v7" in jax.devices()[0].device_kind.lower()
    except Exception:
        return False


def _vmem_budget_and_limit():
    """Generation-aware tile budget + scoped-VMEM limit (bytes)."""
    try:
        phys = int(pltpu.get_tpu_info().vmem_capacity_bytes)
    except Exception:
        phys = 64 << 20                      # conservative: assume v7x-sized VMEM
    if phys <= (64 << 20):                   # v7x-class: 64 MiB per TensorCore
        budget = 24 << 20
    else:                                    # v5e / v6e: 128 MiB physical
        budget = 48 << 20
    limit = min(budget + (16 << 20), phys - (8 << 20))
    return budget, int(limit)


def _pick_tile_n(n, c, in_itemsize, budget):
    """Largest batch tile (multiple of 8) whose padded, double-buffered
    footprint stays inside the generation-specific VMEM budget."""
    if n <= _SUBLANE:
        return n
    padded_c = -(-c // _LANE) * _LANE
    per_row = (2 * padded_c * in_itemsize    # double-buffered pred block
               + 2 * _LANE * 4               # double-buffered labels block (lane padded)
               + 3 * padded_c * 4            # f32 upcast + full-width working set
               + 8 * _LANE * 4)              # lane-padded (tile_n, 1) f32 temporaries
    max_rows = max(_SUBLANE, budget // per_row)
    tile = int(min(n, 32768, max_rows))
    if tile >= n:
        # Single-tile fast path.  On v7x split into >=2 "parallel" tiles so
        # both TensorCores get work; single-TC v5e/v6e keep the full array.
        if _is_v7x() and n >= 2 * _SUBLANE:
            half = -(-(-(-n // 2)) // _SUBLANE) * _SUBLANE   # round_up(ceil(n/2), 8)
            return int(min(half, n))
        return n
    return max(_SUBLANE, (tile // _SUBLANE) * _SUBLANE)


def nce_and_rce_loss(pred, labels, *, alpha, beta, num_classes, tile_n=None):
    """pred: [N, C] float, labels: [N] int. Returns scalar f32 loss."""
    n, c = pred.shape
    assert c == num_classes
    labels2d = labels.astype(jnp.int32).reshape(n, 1)

    budget, vmem_limit = _vmem_budget_and_limit()
    if tile_n is None:
        tile_n = _pick_tile_n(n, c, jnp.dtype(pred.dtype).itemsize, budget)
    tile_n = int(min(tile_n, n))
    num_tiles = -(-n // tile_n)

    kernel = functools.partial(_nce_rce_kernel, alpha=float(alpha),
                               beta=float(beta), n_rows=n, tile_n=tile_n)

    partial = pl.pallas_call(
        kernel,
        out_shape=jax.ShapeDtypeStruct((num_tiles * _SUBLANE, _LANE), jnp.float32),
        grid=(num_tiles,),
        in_specs=[
            pl.BlockSpec((tile_n, c), lambda i: (i, 0)),
            pl.BlockSpec((tile_n, 1), lambda i: (i, 0)),
        ],
        out_specs=pl.BlockSpec((_SUBLANE, _LANE), lambda i: (i, 0)),
        compiler_params=pltpu.CompilerParams(
            dimension_semantics=("parallel",),
            vmem_limit_bytes=vmem_limit),
    )(pred, labels2d)

    # One partial sum per tile lives at row i*8, lane 0; tiny final reduce in JAX.
    return jnp.sum(partial[::_SUBLANE, 0]) / n


def _reference(pred, labels, *, alpha, beta, num_classes):
    # Pure-JAX reference matching the PyTorch module semantics exactly.
    logp = jax.nn.log_softmax(pred, axis=1)
    one_hot = jax.nn.one_hot(labels, num_classes, dtype=jnp.float32)
    nce = -jnp.sum(one_hot * logp, axis=1) / (-jnp.sum(logp, axis=1))
    nce_loss = alpha * jnp.mean(nce)

    p = jax.nn.softmax(pred, axis=1)
    p = jnp.clip(p, 1e-7, 1.0)
    one_hot_c = jnp.clip(one_hot, 1e-4, 1.0)
    rce = -jnp.sum(p * jnp.log(one_hot_c), axis=1)
    rce_loss = beta * jnp.mean(rce)
    return nce_loss + rce_loss


if __name__ == "__main__":
    ALPHA, BETA, NUM_CLASSES = 1.0, 1.0, 10

    key = jax.random.PRNGKey(0)
    k1, k2, k3, k4 = jax.random.split(key, 4)

    # Case 1: small single-tile problem (typical module call shape).
    pred = jax.random.normal(k1, (8, NUM_CLASSES), dtype=jnp.float32)
    labels = jax.random.randint(k2, (8,), 0, NUM_CLASSES, dtype=jnp.int32)
    loss = jax.block_until_ready(
        nce_and_rce_loss(pred, labels, alpha=ALPHA, beta=BETA,
                         num_classes=NUM_CLASSES))
    ref = _reference(pred, labels, alpha=ALPHA, beta=BETA,
                     num_classes=NUM_CLASSES)
    assert jnp.allclose(loss, ref, rtol=1e-3, atol=1e-3), (loss, ref)

    # Case 2: multi-tile grid with a ragged last tile (exercises the tiled,
    # double-buffered, masked partial-sum path).
    pred2 = jax.random.normal(k3, (52, NUM_CLASSES), dtype=jnp.float32)
    labels2 = jax.random.randint(k4, (52,), 0, NUM_CLASSES, dtype=jnp.int32)
    loss2 = jax.block_until_ready(
        nce_and_rce_loss(pred2, labels2, alpha=ALPHA, beta=BETA,
                         num_classes=NUM_CLASSES, tile_n=16))
    ref2 = _reference(pred2, labels2, alpha=ALPHA, beta=BETA,
                      num_classes=NUM_CLASSES)
    assert jnp.allclose(loss2, ref2, rtol=1e-3, atol=1e-3), (loss2, ref2)

    print("KERNEL_OK")
</pallas_src>

<mosaic_0001>
module attributes {stable_mosaic.version = 11 : i64} {
  func.func @_nce_rce_kernel(%arg0: i32, %arg1: memref<8x10xf32, #tpu.memory_space<vmem>>, %arg2: memref<8x1xi32, #tpu.memory_space<vmem>>, %arg3: memref<8x128xf32, #tpu.memory_space<vmem>>) attributes {dimension_semantics = [#tpu.dimension_semantics<parallel>], iteration_bounds = array<i64: 1>, scalar_prefetch = 0 : i64, scratch_operands = 0 : i64, tpu.core_type = #tpu.core_type<tc>, window_params = [{transform_indices = @transform_0, window_bounds = array<i64: 8, 10>}, {transform_indices = @transform_1, window_bounds = array<i64: 8, 1>}, {transform_indices = @transform_2, window_bounds = array<i64: 8, 128>}]} {
    %c0 = arith.constant 0 : index
    %c0_0 = arith.constant 0 : index
    %0 = vector.load %arg1[%c0, %c0_0] : memref<8x10xf32, #tpu.memory_space<vmem>>, vector<8x10xf32>
    %c0_1 = arith.constant 0 : index
    %c0_2 = arith.constant 0 : index
    %1 = vector.load %arg2[%c0_1, %c0_2] : memref<8x1xi32, #tpu.memory_space<vmem>>, vector<8x1xi32>
    %cst = arith.constant dense<0xFF800000> : vector<8xf32>
    %2 = vector.multi_reduction <maximumf>, %0, %cst [1] : vector<8x10xf32> to vector<8xf32>
    %3 = vector.shape_cast %2 : vector<8xf32> to vector<8x1xf32>
    %cst_3 = arith.constant dense<0.000000e+00> : vector<8xf32>
    %4 = vector.multi_reduction <add>, %0, %cst_3 [1] : vector<8x10xf32> to vector<8xf32>
    %5 = vector.shape_cast %4 : vector<8xf32> to vector<8x1xf32>
    %cst_4 = arith.constant 1.000000e+01 : f32
    %6 = vector.broadcast %cst_4 : f32 to vector<8x1xf32>
    %7 = arith.mulf %6, %3 : vector<8x1xf32>
    %8 = arith.subf %5, %7 : vector<8x1xf32>
    %9 = vector.broadcast %3 : vector<8x1xf32> to vector<8x10xf32>
    %10 = arith.subf %0, %9 : vector<8x10xf32>
    %11 = math.exp %10 : vector<8x10xf32>
    %cst_5 = arith.constant dense<0.000000e+00> : vector<8xf32>
    %12 = vector.multi_reduction <add>, %11, %cst_5 [1] : vector<8x10xf32> to vector<8xf32>
    %13 = vector.shape_cast %12 : vector<8xf32> to vector<8x1xf32>
    %14 = math.log %13 : vector<8x1xf32>
    %15 = tpu.iota {dimensions = array<i32: 1>} : vector<8x10xi32>
    %16 = vector.broadcast %1 : vector<8x1xi32> to vector<8x10xi32>
    %17 = arith.cmpi eq, %15, %16 : vector<8x10xi32>
    %cst_6 = arith.constant 0.000000e+00 : f32
    %18 = vector.broadcast %cst_6 : f32 to vector<8x10xf32>
    %19 = arith.select %17, %0, %18 : vector<8x10xi1>, vector<8x10xf32>
    %cst_7 = arith.constant dense<0.000000e+00> : vector<8xf32>
    %20 = vector.multi_reduction <add>, %19, %cst_7 [1] : vector<8x10xf32> to vector<8xf32>
    %21 = vector.shape_cast %20 : vector<8xf32> to vector<8x1xf32>
    %22 = arith.subf %21, %3 : vector<8x1xf32>
    %23 = arith.subf %14, %22 : vector<8x1xf32>
    %cst_8 = arith.constant 1.000000e+01 : f32
    %24 = vector.broadcast %cst_8 : f32 to vector<8x1xf32>
    %25 = arith.mulf %24, %14 : vector<8x1xf32>
    %26 = arith.subf %25, %8 : vector<8x1xf32>
    %27 = tpu.reciprocal %26 {approx = true} : vector<8x1xf32> -> vector<8x1xf32>
    %28 = arith.mulf %23, %27 : vector<8x1xf32>
    %29 = arith.subf %22, %14 : vector<8x1xf32>
    %30 = math.exp %29 : vector<8x1xf32>
    %cst_9 = arith.constant 1.000000e+00 : f32
    %31 = vector.broadcast %cst_9 : f32 to vector<8x1xf32>
    %32 = arith.subf %31, %30 : vector<8x1xf32>
    %cst_10 = arith.constant 9.21034049 : f32
    %33 = vector.broadcast %cst_10 : f32 to vector<8x1xf32>
    %34 = arith.mulf %33, %32 : vector<8x1xf32>
    %cst_11 = arith.constant 1.000000e+00 : f32
    %35 = vector.broadcast %cst_11 : f32 to vector<8x1xf32>
    %36 = arith.mulf %35, %28 : vector<8x1xf32>
    %cst_12 = arith.constant 1.000000e+00 : f32
    %37 = vector.broadcast %cst_12 : f32 to vector<8x1xf32>
    %38 = arith.mulf %37, %34 : vector<8x1xf32>
    %39 = arith.addf %36, %38 : vector<8x1xf32>
    %40 = vector.shape_cast %39 : vector<8x1xf32> to vector<1x8x1xf32>
    %cst_13 = arith.constant dense<0.000000e+00> : vector<1xf32>
    %41 = vector.multi_reduction <add>, %40, %cst_13 [1, 2] : vector<1x8x1xf32> to vector<1xf32>
    %42 = vector.shape_cast %41 : vector<1xf32> to vector<1x1x1xf32>
    %43 = vector.extract %42[0, 0, 0] : f32 from vector<1x1x1xf32>
    %44 = vector.broadcast %43 : f32 to vector<1x1xf32>
    %45 = vector.shape_cast %44 : vector<1x1xf32> to vector<1x1xf32>
    %46 = vector.broadcast %45 : vector<1x1xf32> to vector<8x128xf32>
    %c0_14 = arith.constant 0 : index
    %c0_15 = arith.constant 0 : index
    %47 = vector.load %arg3[%c0_14, %c0_15] : memref<8x128xf32, #tpu.memory_space<vmem>>, vector<8x128xf32>
    tpu.vector_store %arg3[%c0_14, %c0_15], %46 {strides = array<i32>} : memref<8x128xf32, #tpu.memory_space<vmem>>, vector<8x128xf32>,
    return
  }
  func.func @transform_0(%arg0: i32) -> (i32, i32) {
    %c0_i32 = arith.constant 0 : i32
    %c0_i32_0 = arith.constant 0 : i32
    return %arg0, %c0_i32 : i32, i32
  }
  func.func @transform_1(%arg0: i32) -> (i32, i32) {
    %c0_i32 = arith.constant 0 : i32
    %c0_i32_0 = arith.constant 0 : i32
    return %arg0, %c0_i32 : i32, i32
  }
  func.func @transform_2(%arg0: i32) -> (i32, i32) {
    %c0_i32 = arith.constant 0 : i32
    %c0_i32_0 = arith.constant 0 : i32
    return %arg0, %c0_i32 : i32, i32
  }
}

</mosaic_0001>

<bundles_post_ra>
// kernel: tpu_custom_call.1
= control target key start
LH: loop header
LB: loop body
LE: loop exit
PB: predicated region body
PF: predicated region fallthrough
CT: control target
= control target key end

     0   :  { %vm14_vm0 = vcmask 80896   ;;  %s151_s0 = inlined_call_operand.vmem [shape: f32[8,10], index: 0, kind: input, shape index: {}]   ;;  %s152_s1 = inlined_call_operand.vmem [shape: s32[8,1], index: 1, kind: input, shape index: {}]   ;;  %s153_s2 = inlined_call_operand.hbm [shape: f32[8,128], index: 2, kind: output, shape index: {}]  }
   0x1   :  { %v12_v0 = vld [vmem:[%s151_s0] sm:$0xff] }
   0x2   :  { %7 = vsyncpa [#allocation3], 0  ;;  %v15_v1 = vsel %vm14_vm0, %v12_v0, -inf  ;;  %v18_v2 = vsel %vm14_vm0, %v12_v0, 0.0  ;;  %v121_v3 = vmov 0   ;;  %v13_v4 = vld [vmem:[%s152_s1] sm:$0xff]  ;;  %v31_v10 = vlaneseq }
   0x3   :  { %86 = vset.pattern.permute.xlu0 %v121_v3  ;;  %19 = vadd.xlane.f32.xlu2 %v18_v2  ;;  %vm53_vm2 = vcmask 7168   ;;  %s122_s0 = smov [#allocation2]   ;;  %s73_s15 = sshll.u32 %s153_s2, 4  ;;  %s74_s15 = int_to_ptr.hbm [resolvable:$true] %s73_s15 }
   0x4   :  { %16 = vmax.xlane.f32.xlu0 %v15_v1  ;;  %v32_v11 = vand.u32 127, %v31_v10  ;;  %s71_s1 = sshll.u32 %s122_s0, 4  ;;  %s72_s1 = int_to_ptr.vmem [resolvable:$true] %s71_s1 }
  0x18   :  { %34 = vperm.xlu0 %86, %v13_v4  }
  0x76   :  { %v20_v18 = vpop.xlane.xlu2 %19 }
  0x77   :  { %v17_v5 = vpop.xlane.xlu0 %16 }
  0x78   :  { %v23_v6 = vsub.f32 %v12_v0, %v17_v5  ;;  %v21_v16 = vmul.f32 10.0, %v17_v5 }
  0x7a   :  { %v24_v7 = vmul.f32 1.442695, %v23_v6  ;;  %v22_v20 = vsub.f32 %v20_v18, %v21_v16 }
  0x7c   :  { %87 = vpow2.f32 %v24_v7 }
  0x82   :  { %v88_v8 = vpop.eup %87 }
  0x83   :  { %v26_v9 = vsel %vm14_vm0, %v88_v8, 0.0 }
  0x84   :  { %27 = vadd.xlane.f32.xlu1 %v26_v9 }
  0x8a   :  { %v35_v12 = vpop.permute.xlu0 %34 }
  0x8b   :  { %vm36_vm1 = vcmp.eq.s32.totalorder %v32_v11, %v35_v12 }
  0x8c   :  { %v37_v13 = vsel %vm36_vm1, %v12_v0, 0.0 }
  0x8d   :  { %v38_v14 = vsel %vm14_vm0, %v37_v13, 0.0 }
  0x8e   :  { %39 = vadd.xlane.f32.xlu1 %v38_v14 }
  0xf7   :  { %v28_v15 = vpop.xlane.xlu1 %27 }
  0xf8   :  { %89 = vlog2.f32 %v28_v15 }
  0xfe   :  { %v90_v17 = vpop.eup %89 }
  0xff   :  { %v30_v19 = vmul.f32 0.6931472, %v90_v17 }
 0x101   :  { %v43_v21 = vmul.f32 10.0, %v30_v19  ;;  %v40_v22 = vpop.xlane.xlu1 %39 }
 0x102   :  { %v41_v23 = vsub.f32 %v40_v22, %v17_v5 }
 0x103   :  { %v44_v24 = vsub.f32 %v43_v21, %v22_v20 }
 0x104   :  { %v47_v25 = vsub.f32 %v41_v23, %v30_v19  ;;  %v42_v29 = vsub.f32 %v30_v19, %v41_v23 }
 0x105   :  { %91 = vrcp.f32 %v44_v24 }
 0x106   :  { %v48_v26 = vmul.f32 1.442695, %v47_v25 }
 0x108   :  { %93 = vpow2.f32 %v48_v26 }
 0x10b   :  { %v92_v27 = vpop.eup %91 }
 0x10c   :  { %v46_v31 = vmul.f32 %v92_v27, %v42_v29 }
 0x10e   :  { %v94_v28 = vpop.eup %93 }
 0x10f   :  { %v50_v30 = vsub.f32 1.0, %v94_v28 }
 0x111   :  { %v51_v32 = vmul.f32 9.2103405, %v50_v30 }
 0x113   :  { %v52_v33 = vadd.f32 %v51_v32, %v46_v31 }
 0x115   :  { %v54_v34 = vsel %vm53_vm2, %v52_v33, 0.0 }
 0x116   :  { %55 = vadd.xlane.f32.xlu2 %v54_v34 }
 0x189   :  { %v56_v35 = vpop.xlane.xlu2 %55 }
 0x18a   :  { %v57_v36 = vrot.slane %v56_v35, 4 }
 0x18c   :  { %v58_v37 = vadd.f32 %v57_v36, %v56_v35 }
 0x18e   :  { %v59_v38 = vrot.slane %v58_v37, 2 }
 0x190   :  { %v60_v39 = vadd.f32 %v59_v38, %v58_v37 }
 0x192   :  { %v61_v40 = vrot.slane %v60_v39, 1 }
 0x194   :  { %v62_v41 = vadd.f32 %v61_v40, %v60_v39 }
 0x196   :  { %82 = vpush %v62_v41 }
 0x1c7   :  { %s83_s16 = spop %82 }
 0x1c8   :  { %v64_v42 = vstv %s83_s16 }
 0x1c9   :  { %65 = vst [vmem:[#allocation2] sm:$0xff] %v64_v42 }
 0x1ca   :  { %76 = dma.vmem_to_hbm [thread:$0]  %s72_s1, 128, %s74_s15, [#allocation3]  }
 0x1cb   :  { %119 = dma.done.wait [#allocation3], 128  }
 0x1cc   :  { %120 = vsyncadd [#allocation3], 4294967168 }
 0x1cd   :  { %81 = vsyncpa [#allocation3], 1 }

</bundles_post_ra>
